<compile_context>
chip_gen: v7x
topology: tpu7x:2x2x1
jax: 0.10.0
libtpu: 0.0.40
codegen_flags: <defaults>
</compile_context>

<pallas_src>
import jax
import jax.numpy as jnp
from jax.experimental import pallas as pl
from jax.experimental.pallas import tpu as pltpu

_BLOCK_ROWS = 2048         # tiled path: rows per block (1 MiB lane-padded f32)
_GRIDLESS_MAX_ROWS = 8192  # gridless path: <= ~8 MiB VMEM (in + out), all gens


def _affine_kernel(w_ref, b_ref, x_ref, o_ref):
    # w_ref, b_ref: shape-(1,) scalars in SMEM; x_ref / o_ref: VMEM blocks.
    o_ref[...] = x_ref[...] * w_ref[0] + b_ref[0]


def _linear_gridless(x, w, b):
    """Whole array as one full-array VMEM block: no grid, no padding, no copies."""
    return pl.pallas_call(
        _affine_kernel,
        out_shape=jax.ShapeDtypeStruct(x.shape, jnp.float32),
        in_specs=[
            pl.BlockSpec(memory_space=pltpu.SMEM),   # w scalar
            pl.BlockSpec(memory_space=pltpu.SMEM),   # b scalar
            pl.BlockSpec(memory_space=pltpu.VMEM),   # x, full array
        ],
        out_specs=pl.BlockSpec(memory_space=pltpu.VMEM),
    )(w, b, x)


def _linear_tiled(x, w, b):
    """1-D 'parallel' grid over the batch dim; ragged tail handled by Pallas
    boundary clamping (no host-side pad, no slice)."""
    B, IN = x.shape
    grid = (pl.cdiv(B, _BLOCK_ROWS),)
    return pl.pallas_call(
        _affine_kernel,
        out_shape=jax.ShapeDtypeStruct((B, IN), jnp.float32),
        grid=grid,
        in_specs=[
            pl.BlockSpec(memory_space=pltpu.SMEM),                 # w scalar
            pl.BlockSpec(memory_space=pltpu.SMEM),                 # b scalar
            pl.BlockSpec((_BLOCK_ROWS, IN), lambda i: (i, 0)),     # x block
        ],
        out_specs=pl.BlockSpec((_BLOCK_ROWS, IN), lambda i: (i, 0)),
        compiler_params=pltpu.CompilerParams(
            dimension_semantics=("parallel",),   # both TCs on v7x take a share
        ),
    )(w, b, x)


def linear_1_1(x, weight, bias):
    """y = x @ weight.T + bias  for weight (1,1), bias (1,), x (B,1)."""
    B, IN = x.shape
    assert IN == 1 and weight.shape == (1, 1) and bias.shape == (1,)

    x = x.astype(jnp.float32)
    w = weight.astype(jnp.float32).reshape(1)
    b = bias.astype(jnp.float32).reshape(1)

    if B <= _GRIDLESS_MAX_ROWS:
        return _linear_gridless(x, w, b)
    return _linear_tiled(x, w, b)


if __name__ == "__main__":
    key = jax.random.PRNGKey(0)
    kw, kb, kx1, kx2 = jax.random.split(key, 4)

    # nn.Linear(1,1) init: weight (1,1), bias (1,), uniform(-1, 1) for fan_in=1.
    weight = jax.random.uniform(kw, (1, 1), jnp.float32, minval=-1.0, maxval=1.0)
    bias = jax.random.uniform(kb, (1,), jnp.float32, minval=-1.0, maxval=1.0)

    # Spec workload: hour_var = tensor([[5.0]])  -> shape (1, 1), gridless path.
    hours_of_study = 5.0
    hour_var = jnp.array([[hours_of_study]], dtype=jnp.float32)
    y_pred = jax.block_until_ready(linear_1_1(hour_var, weight, bias))
    y_ref = hour_var @ weight.T + bias
    assert y_pred.shape == (1, 1)
    assert jnp.allclose(y_pred, y_ref, atol=1e-6, rtol=1e-6)

    # Mid-size batch: now a single gridless VMEM block (no pad / grid / slice).
    x_mid = jax.random.normal(kx1, (2048, 1), jnp.float32)
    y_mid = jax.block_until_ready(linear_1_1(x_mid, weight, bias))
    assert jnp.allclose(y_mid, x_mid @ weight.T + bias, atol=1e-5, rtol=1e-5)

    # Large batch: tiled path, 2048-row blocks, "parallel" grid with >= 2 steps.
    x_big = jax.random.normal(kx2, (12288, 1), jnp.float32)
    y_big = jax.block_until_ready(linear_1_1(x_big, weight, bias))
    assert jnp.allclose(y_big, x_big @ weight.T + bias, atol=1e-5, rtol=1e-5)

    print("KERNEL_OK")
</pallas_src>

<mosaic_0001>
module attributes {stable_mosaic.version = 11 : i64} {
  func.func @_affine_kernel(%arg0: memref<1xf32, #tpu.memory_space<smem>>, %arg1: memref<1xf32, #tpu.memory_space<smem>>, %arg2: memref<1x1xf32, #tpu.memory_space<vmem>>, %arg3: memref<1x1xf32, #tpu.memory_space<vmem>>) attributes {dimension_semantics = [], scalar_prefetch = 0 : i64, scratch_operands = 0 : i64, tpu.core_type = #tpu.core_type<tc>} {
    %c0 = arith.constant 0 : index
    %c0_0 = arith.constant 0 : index
    %0 = vector.load %arg2[%c0, %c0_0] : memref<1x1xf32, #tpu.memory_space<vmem>>, vector<1x1xf32>
    %c0_1 = arith.constant 0 : index
    %1 = memref.load %arg0[%c0_1] : memref<1xf32, #tpu.memory_space<smem>>
    %2 = vector.broadcast %1 : f32 to vector<1x1xf32>
    %3 = arith.mulf %0, %2 : vector<1x1xf32>
    %c0_2 = arith.constant 0 : index
    %4 = memref.load %arg1[%c0_2] : memref<1xf32, #tpu.memory_space<smem>>
    %5 = vector.broadcast %4 : f32 to vector<1x1xf32>
    %6 = arith.addf %3, %5 : vector<1x1xf32>
    %c0_3 = arith.constant 0 : index
    %c0_4 = arith.constant 0 : index
    %7 = vector.load %arg3[%c0_3, %c0_4] : memref<1x1xf32, #tpu.memory_space<vmem>>, vector<1x1xf32>
    tpu.vector_store %arg3[%c0_3, %c0_4], %6 {strides = array<i32>} : memref<1x1xf32, #tpu.memory_space<vmem>>, vector<1x1xf32>,
    return
  }
}

</mosaic_0001>

<bundles_post_ra>
// kernel: tpu_custom_call.1
= control target key start
LH: loop header
LB: loop body
LE: loop exit
PB: predicated region body
PF: predicated region fallthrough
CT: control target
= control target key end

     0   :  { %s109_s0 = inlined_call_operand.<no memory space> [shape: f32[1], index: 0, kind: input, shape index: {}]   ;;  %s110_s1 = inlined_call_operand.<no memory space> [shape: f32[1], index: 1, kind: input, shape index: {}]   ;;  %s111_s2 = inlined_call_operand.<no memory space> [shape: f32[1,1], index: 2, kind: input, shape index: {}]   ;;  %s112_s3 = inlined_call_operand.hbm [shape: f32[1,1], index: 3, kind: output, shape index: {}]  }
   0x1   :  { %v10_v0 = vstv %s111_s2 }
   0x2   :  { %11 = vst [vmem:[#allocation4] sm:$0x1] %v10_v0 }
   0x3   :  { %v21_v2 = vstv %s109_s0  ;;  %v24_v3 = vstv %s110_s1 }
   0x9   :  { %v19_v1 = vld [vmem:[#allocation4] sm:$0x1] }
   0xa   :  { %12 = vsyncpa [#allocation6], 0  ;;  %v22_v4 = vmul.f32 %v21_v2, %v19_v1  ;;  %s67_s18 = smov [#allocation5]   ;;  %vm26_vm0 = vcmask 0  }
   0xb   :  { %s34_s19 = sshll.u32 %s67_s18, 4  ;;  %s35_s19 = int_to_ptr.vmem [resolvable:$true] %s34_s19 }
   0xc   :  { %v25_v5 = vadd.f32 %v24_v3, %v22_v4  ;;  %s43_s20 = scalar_lea.vmem %s35_s19, 16  ;;  %s47_s2 = scalar_lea.vmem %s35_s19, 32 }
   0xd   :  { %p44_p0 = scmp.ne.s32.totalorder %s35_s19, %s43_s20  ;;  %p48_p1 = scmp.lt.s32.totalorder %s35_s19, %s35_s19 }
   0xe   :  { %27 = vst.msk [vmem:[#allocation5] sm:$0x1] %vm26_vm0, %v25_v5  ;;  %p49_p2 = scmp.lt.s32.totalorder %s47_s2, %s43_s20 }
  0x10   :  { %p50_p3 = por %p49_p2, %p48_p1 }
  0x12   :  { %p51_p4 = pnand %p50_p3, %p44_p0 }
  0x14   :  { %54 = shalt.err (!%p51_p4)
}
  0x15   :  { %s55_s1 = scalar_lea.hbm %s112_s3, 16 }
  0x16   :  { %p56_p5 = scmp.ne.s32.totalorder %s112_s3, %s55_s1  ;;  %p59_p6 = scmp.lt.u32.totalorder %s55_s1, %s112_s3 }
  0x18   :  { %p61_p7 = pnand %p59_p6, %p56_p5 }
  0x1a   :  { %64 = shalt.err (!%p61_p7)
}
  0x1b   :  { %37 = dma.vmem_to_hbm [thread:$0]  %s35_s19, 16, %s112_s3, [#allocation6]  }
  0x1c   :  { %65 = dma.done.wait [#allocation6], 16  }
  0x1d   :  { %66 = vsyncadd [#allocation6], 4294967280 }
  0x1e   :  { %41 = vsyncpa [#allocation6], 1 }

</bundles_post_ra>
